<compile_context>
chip_gen: v6e
topology: v6e:2x2x1
jax: 0.10.0
libtpu: 0.0.40
codegen_flags: <defaults>
</compile_context>

<pallas_src>
import math
import functools

import jax
import jax.numpy as jnp
import numpy as np
from jax.experimental import pallas as pl
from jax.experimental.pallas import tpu as pltpu


@functools.lru_cache(maxsize=1)
def _vmem_limit_bytes():
    """Generation-dependent VMEM cap with headroom for compiler scratch and
    double-buffered pipeline blocks (~112 MiB on v5e/v6e, ~56 MiB on v7x)."""
    default = 64 * 1024 * 1024
    try:
        info = pltpu.get_tpu_info()
        cap = int(getattr(info, "vmem_capacity_bytes", 0) or 0)
    except Exception:
        return default
    if cap <= 0:
        return default
    return cap - max(cap // 8, 8 * 1024 * 1024)


# --------------------------- fused QKV projection -----------------------------

def _qkv_kernel(x_ref, w_ref, b_ref, q_ref, k_ref, v_ref, *, hidden):
    # x: [tm, K] (input dtype), w: [K, 3H] bf16 (resident), b: [1, 3H] f32.
    x = x_ref[...].astype(jnp.bfloat16)
    y = jnp.dot(x, w_ref[...], preferred_element_type=jnp.float32) + b_ref[...]
    H = hidden
    # lane-aligned static slices of the fused [tm, 3H] result
    q_ref[...] = y[:, 0 * H:1 * H].astype(q_ref.dtype)
    k_ref[...] = y[:, 1 * H:2 * H].astype(k_ref.dtype)
    v_ref[...] = y[:, 2 * H:3 * H].astype(v_ref.dtype)


def qkv_projection(x2d, params, *, q_scale=1.0, block_m=512,
                   out_dtype=jnp.bfloat16):
    """x2d: [M, K]; params in PyTorch Linear convention (weight [out, in], bias [out]).
    The softmax 1/sqrt(D) scale is folded into the Q weights via `q_scale`
    (applied in f32 before the bf16 cast).  Returns q, k, v each [M, H]."""
    M, K = x2d.shape
    H = params["q_w"].shape[0]
    tm = min(M, block_m)  # tm == M (exempt from (8,128) rule) or a multiple of 8

    f32 = jnp.float32
    wq = params["q_w"].astype(f32).T * q_scale          # fold scale in f32
    wk = params["k_w"].astype(f32).T
    wv = params["v_w"].astype(f32).T
    w_qkv = jnp.concatenate([wq, wk, wv], axis=1).astype(jnp.bfloat16)   # [K, 3H]
    b_qkv = jnp.concatenate([params["q_b"].astype(f32) * q_scale,
                             params["k_b"].astype(f32),
                             params["v_b"].astype(f32)]).reshape(1, 3 * H)

    x_spec = pl.BlockSpec((tm, K), lambda i: (i, 0))
    w_spec = pl.BlockSpec((K, 3 * H), lambda i: (0, 0))   # resident across grid
    b_spec = pl.BlockSpec((1, 3 * H), lambda i: (0, 0))
    o_spec = pl.BlockSpec((tm, H), lambda i: (i, 0))
    o_shape = jax.ShapeDtypeStruct((M, H), out_dtype)

    kernel = functools.partial(_qkv_kernel, hidden=H)
    return pl.pallas_call(
        kernel,
        out_shape=(o_shape, o_shape, o_shape),
        grid=(pl.cdiv(M, tm),),
        in_specs=[x_spec, w_spec, b_spec],
        out_specs=(o_spec, o_spec, o_spec),
        compiler_params=pltpu.CompilerParams(
            dimension_semantics=("parallel",),
            vmem_limit_bytes=_vmem_limit_bytes(),
        ),
    )(x2d, w_qkv, b_qkv)


# ------------------------------ attention core --------------------------------

def _attention_kernel(q_ref, k_ref, v_ref, mask_ref, ctx_ref, *probs_refs,
                      heads_per_block, head_dim):
    # q/k/v: [S, G*D] lane-dense tile for the current (batch, head-group).
    G, D = heads_per_block, head_dim
    S = q_ref.shape[0]

    def to_heads(ref):
        # [S, G*D] -> [G, S, D]; minor (lane) dim preserved.
        # TODO(synk): evaluate pltpu.einshape here to cut XLU relayout traffic.
        return jnp.transpose(ref[...].reshape(S, G, D), (1, 0, 2))

    qh, kh, vh = to_heads(q_ref), to_heads(k_ref), to_heads(v_ref)

    # scores = (Q*scale) K^T + mask  — 1/sqrt(D) already folded into Q weights.
    scores = jnp.einsum("gqd,gkd->gqk", qh, kh,
                        preferred_element_type=jnp.float32)
    scores = scores + mask_ref[...]            # [1, S] additive mask, broadcasts

    # numerically stable softmax in f32 (v5e has no bf16 VPU/EUP) with DEFERRED
    # normalization: context uses the un-normalized exp weights and is rescaled
    # by a [G,S,1] reciprocal afterwards (D-sized multiply instead of S-sized).
    m = jnp.max(scores, axis=-1, keepdims=True)
    e = jnp.exp(scores - m)                               # [G, S, S] f32
    denom = jnp.sum(e, axis=-1, keepdims=True)            # [G, S, 1]

    # TODO(synk): training-mode attention dropout would use pltpu.prng_seed /
    #             pltpu.prng_random_bits here; eval-mode nn.Dropout is identity.
    # TODO(synk): head_mask (None in this usage) would be a per-head multiply.

    if probs_refs:  # only materialized when output_attentions=True
        # exact normalization for the probs handed back to the caller
        probs_refs[0][...] = (e / denom).astype(probs_refs[0].dtype)

    ctx = jnp.einsum("gqk,gkd->gqd", e.astype(vh.dtype), vh,
                     preferred_element_type=jnp.float32)  # [G, S, D] un-normalized
    ctx = ctx * pl.reciprocal(denom, approx=True)          # EUP vrcp slot, ~free
    # back to lane-dense [S, G*D]; stored straight into the [B, S, H] layout
    ctx_ref[...] = jnp.transpose(ctx, (1, 0, 2)).reshape(S, G * D).astype(ctx_ref.dtype)


def _heads_per_block(num_heads, head_dim, seq_len, vmem_limit, *,
                     out_bytes=2, want_probs=False):
    """Largest head group G (divisor of num_heads with G*D % 128 == 0) whose
    attention working set fits the VMEM budget.  Falls back to all heads when
    no group is lane-aligned (block then spans the full H dim -> exempt)."""
    lane_ok = [g for g in range(1, num_heads + 1)
               if num_heads % g == 0 and (g * head_dim) % 128 == 0]
    if not lane_ok:
        return num_heads
    budget = int(vmem_limit * 0.45)   # headroom for double buffering + scratch
    best = lane_ok[0]
    for g in lane_ok:                 # ascending; keep the largest that fits
        work = 2 * g * seq_len * seq_len * 4                    # scores + exp (f32)
        work += 2 * 3 * seq_len * g * head_dim * 2              # q/k/v bf16 tiles, 2-buffered
        work += 2 * seq_len * g * head_dim * out_bytes          # ctx tile, 2-buffered
        if want_probs:
            work += 2 * g * seq_len * seq_len * 4               # probs tile
        if work <= budget:
            best = g
    return best


def attention_core(q, k, v, ext_mask, num_heads, *, output_attentions=False,
                   out_dtype=jnp.bfloat16, probs_dtype=jnp.bfloat16):
    """q/k/v: [B, S, H] with heads packed along the last dim; ext_mask: [B,1,1,S]
    additive.  Returns (ctx [B,S,H], probs [B,nH,S,S] or None)."""
    B, S, H = q.shape
    D = H // num_heads
    vmem_limit = _vmem_limit_bytes()
    G = _heads_per_block(num_heads, D, S, vmem_limit,
                         out_bytes=jnp.dtype(out_dtype).itemsize,
                         want_probs=output_attentions)
    n_groups = num_heads // G

    kernel = functools.partial(_attention_kernel, heads_per_block=G, head_dim=D)

    qkv_spec = pl.BlockSpec((None, S, G * D), lambda b, g: (b, 0, g))
    mask_spec = pl.BlockSpec((None, None, 1, S), lambda b, g: (b, 0, 0, 0))
    ctx_spec = pl.BlockSpec((None, S, G * D), lambda b, g: (b, 0, g))

    ctx_shape = jax.ShapeDtypeStruct((B, S, H), out_dtype)
    if output_attentions:
        out_shape = (ctx_shape,
                     jax.ShapeDtypeStruct((B, num_heads, S, S), probs_dtype))
        out_specs = (ctx_spec,
                     pl.BlockSpec((None, G, S, S), lambda b, g: (b, g, 0, 0)))
    else:
        out_shape = ctx_shape
        out_specs = ctx_spec

    outs = pl.pallas_call(
        kernel,
        out_shape=out_shape,
        grid=(B, n_groups),
        in_specs=[qkv_spec, qkv_spec, qkv_spec, mask_spec],
        out_specs=out_specs,
        compiler_params=pltpu.CompilerParams(
            dimension_semantics=("parallel", "parallel"),
            vmem_limit_bytes=vmem_limit,
        ),
    )(q, k, v, ext_mask)

    if output_attentions:
        ctx, probs = outs
        return ctx, probs
    return outs, None


# --------------------------- full module forward ------------------------------

def bert_self_attention(hidden_states, attention_mask, params, num_heads,
                        *, output_attentions=False,
                        out_dtype=jnp.bfloat16, probs_dtype=jnp.bfloat16):
    """Mirrors BertSelfAttention.forward for the self-attention path.
    hidden_states: [B, S, H]; attention_mask: extended additive mask [B,1,1,S] or None.
    Returns (context,) or (context, attention_probs) like the PyTorch module."""
    B, S, H = hidden_states.shape
    D = H // num_heads
    if attention_mask is None:
        attention_mask = jnp.zeros((B, 1, 1, S), dtype=jnp.float32)
    # TODO(synk): cross-attention (encoder_hidden_states) would run K/V projections
    #             on the encoder states; only the self-attention path is implemented.

    q_scale = 1.0 / math.sqrt(D)   # folded into the Q projection (f32, pre-bf16)
    q2d, k2d, v2d = qkv_projection(hidden_states.reshape(B * S, H), params,
                                   q_scale=q_scale)
    q = q2d.reshape(B, S, H)   # free reshapes; heads stay packed along the last dim
    k = k2d.reshape(B, S, H)
    v = v2d.reshape(B, S, H)

    ctx, probs = attention_core(q, k, v, attention_mask.astype(jnp.float32),
                                num_heads, output_attentions=output_attentions,
                                out_dtype=out_dtype, probs_dtype=probs_dtype)
    if output_attentions:
        return ctx, probs
    return (ctx,)


# -------------------------------- reference ------------------------------------

def reference(hidden_states, ext_mask, params, num_heads):
    B, S, H = hidden_states.shape
    D = H // num_heads
    q = hidden_states @ params["q_w"].T + params["q_b"]
    k = hidden_states @ params["k_w"].T + params["k_b"]
    v = hidden_states @ params["v_w"].T + params["v_b"]

    def to_heads(t):
        return t.reshape(B, S, num_heads, D).transpose(0, 2, 1, 3)

    qh, kh, vh = to_heads(q), to_heads(k), to_heads(v)
    scores = jnp.einsum("bhqd,bhkd->bhqk", qh, kh) / math.sqrt(D)
    scores = scores + ext_mask
    probs = jax.nn.softmax(scores, axis=-1)
    ctx = jnp.einsum("bhqk,bhkd->bhqd", probs, vh)
    return ctx.transpose(0, 2, 1, 3).reshape(B, S, H), probs


# ---------------------------------- main ---------------------------------------

if __name__ == "__main__":
    B, S, H, nH = 2, 8, 32, 4  # hidden=32, heads=4 -> head_dim=8

    key = jax.random.PRNGKey(0)
    ks = jax.random.split(key, 8)

    hidden_states = jax.random.normal(ks[0], (B, S, H), dtype=jnp.float32)

    # deterministic parameter init (PyTorch Linear convention: weight [out, in])
    params = {
        "q_w": jax.random.normal(ks[1], (H, H), dtype=jnp.float32) * 0.05,
        "q_b": jax.random.normal(ks[2], (H,), dtype=jnp.float32) * 0.05,
        "k_w": jax.random.normal(ks[3], (H, H), dtype=jnp.float32) * 0.05,
        "k_b": jax.random.normal(ks[4], (H,), dtype=jnp.float32) * 0.05,
        "v_w": jax.random.normal(ks[5], (H, H), dtype=jnp.float32) * 0.05,
        "v_b": jax.random.normal(ks[6], (H,), dtype=jnp.float32) * 0.05,
    }

    # attention mask: mask out the last 2 key positions of batch 1
    pad_mask = jnp.ones((B, S), dtype=jnp.float32)
    pad_mask = pad_mask.at[1, -2:].set(0.0)
    ext_mask = (1.0 - pad_mask)[:, None, None, :] * -10000.0  # [B, 1, 1, S]

    # output_attentions=True path (returns both, like the PyTorch module)
    ctx, probs = bert_self_attention(hidden_states, ext_mask, params, nH,
                                     output_attentions=True)
    jax.block_until_ready((ctx, probs))

    # default path (context only; probs never materialized)
    (ctx_only,) = bert_self_attention(hidden_states, ext_mask, params, nH)
    jax.block_until_ready(ctx_only)

    ctx_ref, probs_ref = reference(hidden_states, ext_mask, params, nH)

    ctx_f32 = np.asarray(ctx.astype(jnp.float32))
    ctx_only_f32 = np.asarray(ctx_only.astype(jnp.float32))
    probs_f32 = np.asarray(probs.astype(jnp.float32))

    # bf16 MXU operands / bf16 outputs + approx reciprocal -> loosened tolerances
    np.testing.assert_allclose(ctx_f32, np.asarray(ctx_ref), atol=3e-2, rtol=3e-2)
    np.testing.assert_allclose(ctx_only_f32, np.asarray(ctx_ref), atol=3e-2, rtol=3e-2)
    np.testing.assert_allclose(probs_f32, np.asarray(probs_ref), atol=2e-2, rtol=2e-2)

    print("KERNEL_OK")
</pallas_src>

<mosaic_0001>
module attributes {stable_mosaic.version = 11 : i64} {
  func.func @_qkv_kernel(%arg0: i32, %arg1: memref<16x32xf32, #tpu.memory_space<vmem>>, %arg2: memref<32x96xbf16, #tpu.memory_space<vmem>>, %arg3: memref<1x96xf32, #tpu.memory_space<vmem>>, %arg4: memref<16x32xbf16, #tpu.memory_space<vmem>>, %arg5: memref<16x32xbf16, #tpu.memory_space<vmem>>, %arg6: memref<16x32xbf16, #tpu.memory_space<vmem>>) attributes {dimension_semantics = [#tpu.dimension_semantics<parallel>], iteration_bounds = array<i64: 1>, scalar_prefetch = 0 : i64, scratch_operands = 0 : i64, tpu.core_type = #tpu.core_type<tc>, window_params = [{transform_indices = @transform_0, window_bounds = array<i64: 16, 32>}, {pipeline_mode = #tpu.pipeline_mode<synchronous>, transform_indices = @transform_1, window_bounds = array<i64: 32, 96>}, {pipeline_mode = #tpu.pipeline_mode<synchronous>, transform_indices = @transform_2, window_bounds = array<i64: 1, 96>}, {transform_indices = @transform_3, window_bounds = array<i64: 16, 32>}, {transform_indices = @transform_4, window_bounds = array<i64: 16, 32>}, {transform_indices = @transform_5, window_bounds = array<i64: 16, 32>}]} {
    %c0 = arith.constant 0 : index
    %c0_0 = arith.constant 0 : index
    %0 = vector.load %arg1[%c0, %c0_0] : memref<16x32xf32, #tpu.memory_space<vmem>>, vector<16x32xf32>
    %1 = arith.truncf %0 : vector<16x32xf32> to vector<16x32xbf16>
    %c0_1 = arith.constant 0 : index
    %c0_2 = arith.constant 0 : index
    %2 = vector.load %arg2[%c0_1, %c0_2] : memref<32x96xbf16, #tpu.memory_space<vmem>>, vector<32x96xbf16>
    %cst = arith.constant dense<0.000000e+00> : vector<16x96xf32>
    %3 = tpu.matmul %1, %2, %cst {dimension_numbers = #tpu.dot_dimension_numbers<[1], [0], [0], [1], [0, 0, 1, 1], [], []>} : vector<16x32xbf16>, vector<32x96xbf16>, vector<16x96xf32> -> vector<16x96xf32>
    %c0_3 = arith.constant 0 : index
    %c0_4 = arith.constant 0 : index
    %4 = vector.load %arg3[%c0_3, %c0_4] : memref<1x96xf32, #tpu.memory_space<vmem>>, vector<1x96xf32>
    %5 = vector.broadcast %4 : vector<1x96xf32> to vector<16x96xf32>
    %6 = arith.addf %3, %5 : vector<16x96xf32>
    %7 = vector.extract_strided_slice %6 {offsets = [0, 0], sizes = [16, 32], strides = [1, 1]} : vector<16x96xf32> to vector<16x32xf32>
    %8 = arith.truncf %7 : vector<16x32xf32> to vector<16x32xbf16>
    %c0_5 = arith.constant 0 : index
    %c0_6 = arith.constant 0 : index
    %9 = vector.load %arg4[%c0_5, %c0_6] : memref<16x32xbf16, #tpu.memory_space<vmem>>, vector<16x32xbf16>
    tpu.vector_store %arg4[%c0_5, %c0_6], %8 {strides = array<i32>} : memref<16x32xbf16, #tpu.memory_space<vmem>>, vector<16x32xbf16>,
    %10 = vector.extract_strided_slice %6 {offsets = [0, 32], sizes = [16, 32], strides = [1, 1]} : vector<16x96xf32> to vector<16x32xf32>
    %11 = arith.truncf %10 : vector<16x32xf32> to vector<16x32xbf16>
    %c0_7 = arith.constant 0 : index
    %c0_8 = arith.constant 0 : index
    %12 = vector.load %arg5[%c0_7, %c0_8] : memref<16x32xbf16, #tpu.memory_space<vmem>>, vector<16x32xbf16>
    tpu.vector_store %arg5[%c0_7, %c0_8], %11 {strides = array<i32>} : memref<16x32xbf16, #tpu.memory_space<vmem>>, vector<16x32xbf16>,
    %13 = vector.extract_strided_slice %6 {offsets = [0, 64], sizes = [16, 32], strides = [1, 1]} : vector<16x96xf32> to vector<16x32xf32>
    %14 = arith.truncf %13 : vector<16x32xf32> to vector<16x32xbf16>
    %c0_9 = arith.constant 0 : index
    %c0_10 = arith.constant 0 : index
    %15 = vector.load %arg6[%c0_9, %c0_10] : memref<16x32xbf16, #tpu.memory_space<vmem>>, vector<16x32xbf16>
    tpu.vector_store %arg6[%c0_9, %c0_10], %14 {strides = array<i32>} : memref<16x32xbf16, #tpu.memory_space<vmem>>, vector<16x32xbf16>,
    return
  }
  func.func @transform_0(%arg0: i32) -> (i32, i32) {
    %c0_i32 = arith.constant 0 : i32
    %c0_i32_0 = arith.constant 0 : i32
    return %arg0, %c0_i32 : i32, i32
  }
  func.func @transform_1(%arg0: i32) -> (i32, i32) {
    %c0_i32 = arith.constant 0 : i32
    %c0_i32_0 = arith.constant 0 : i32
    %c0_i32_1 = arith.constant 0 : i32
    return %c0_i32, %c0_i32_0 : i32, i32
  }
  func.func @transform_2(%arg0: i32) -> (i32, i32) {
    %c0_i32 = arith.constant 0 : i32
    %c0_i32_0 = arith.constant 0 : i32
    %c0_i32_1 = arith.constant 0 : i32
    return %c0_i32, %c0_i32_0 : i32, i32
  }
  func.func @transform_3(%arg0: i32) -> (i32, i32) {
    %c0_i32 = arith.constant 0 : i32
    %c0_i32_0 = arith.constant 0 : i32
    return %arg0, %c0_i32 : i32, i32
  }
  func.func @transform_4(%arg0: i32) -> (i32, i32) {
    %c0_i32 = arith.constant 0 : i32
    %c0_i32_0 = arith.constant 0 : i32
    return %arg0, %c0_i32 : i32, i32
  }
  func.func @transform_5(%arg0: i32) -> (i32, i32) {
    %c0_i32 = arith.constant 0 : i32
    %c0_i32_0 = arith.constant 0 : i32
    return %arg0, %c0_i32 : i32, i32
  }
}

</mosaic_0001>

<bundles_post_ra>
// kernel: tpu_custom_call.1
= control target key start
LH: loop header
LB: loop body
LE: loop exit
PB: predicated region body
PF: predicated region fallthrough
CT: control target
= control target key end

     0   :  { %11 = vsyncpa [#allocation3], 0  ;;  %s416_s0 = inlined_call_operand.hbm [shape: f32[16,32], index: 0, kind: input, shape index: {}]   ;;  %s417_s1 = inlined_call_operand.hbm [shape: bf16[32,96], index: 1, kind: input, shape index: {}]   ;;  %s418_s2 = inlined_call_operand.vmem [shape: f32[1,96], index: 2, kind: input, shape index: {}]   ;;  %s419_s3 = inlined_call_operand.hbm [shape: bf16[16,32], index: 3, kind: output, shape index: {0}]   ;;  %s420_s4 = inlined_call_operand.hbm [shape: bf16[16,32], index: 4, kind: output, shape index: {1}]   ;;  %s421_s5 = inlined_call_operand.hbm [shape: bf16[16,32], index: 5, kind: output, shape index: {2}]  }
   0x1   :  { %12 = vsyncpa [#allocation6], 0 }
   0x2   :  { %13 = vsyncpa [#allocation4], 0 }
   0x3   :  { %14 = vsyncpa [#allocation9], 0  ;;  %s336_s18 = smov [#allocation2]  }
   0x4   :  { %s20_s19 = sshll.u32 %s336_s18, 4  ;;  %s21_s19 = int_to_ptr.vmem [resolvable:$true] %s20_s19 }
   0x5   :  { %s236_s20 = scalar_lea.vmem %s21_s19, 256  ;;  %p241_p1 = scmp.lt.s32.totalorder %s21_s19, %s21_s19 }
   0x6   :  { %p237_p0 = scmp.ne.s32.totalorder %s21_s19, %s236_s20  ;;  %p242_p2 = scmp.lt.s32.totalorder %s236_s20, %s236_s20 }
   0x8   :  { %p243_p3 = por %p242_p2, %p241_p1 }
   0xa   :  { %p244_p4 = pnand %p243_p3, %p237_p0 }
   0xc   :  { %247 = shalt.err (!%p244_p4)
}
   0xd   :  { %s337_s21 = smov 128   ;;  %s338_s22 = smov 8  }
   0xe   :  { %26 = dma.hbm_to_vmem [thread:$0]  %s416_s0, 256, %s21_s19, [#allocation3], %s337_s21, %s337_s21, %s338_s22  }
   0xf   :  { %s339_s25 = smov [#allocation5]  }
  0x10   :  { %s32_s26 = sshll.u32 %s339_s25, 4  ;;  %s33_s26 = int_to_ptr.vmem [resolvable:$true] %s32_s26 }
  0x11   :  { %s256_s27 = scalar_lea.vmem %s33_s26, 256  ;;  %p261_p6 = scmp.lt.s32.totalorder %s33_s26, %s33_s26 }
  0x12   :  { %p257_p5 = scmp.ne.s32.totalorder %s33_s26, %s256_s27  ;;  %p262_p7 = scmp.lt.s32.totalorder %s256_s27, %s256_s27 }
  0x14   :  { %p263_p8 = por %p262_p7, %p261_p6 }
  0x16   :  { %p264_p9 = pnand %p263_p8, %p257_p5 }
  0x18   :  { %267 = shalt.err (!%p264_p9)
}
  0x19   :  { %s340_s28 = smov 64   ;;  %s341_s29 = smov 4  }
  0x1a   :  { %38 = dma.hbm_to_vmem [thread:$0]  %s417_s1, 256, %s33_s26, [#allocation6], %s340_s28, %s340_s28, %s341_s29  }
  0x1b   :  { %328 = dma.done.wait [#allocation3], 256  }
  0x1c   :  { %329 = vsyncadd [#allocation3], 4294967040 }
  0x1d   :  { %330 = dma.done.wait [#allocation6], 256  }
  0x1e   :  { %331 = vsyncadd [#allocation6], 4294967040  ;;  %v342_v0 = vmov 0.0   ;;  %vm343_vm0 = vmmov 0   ;;  %v226_v1 = vld [vmem:[#allocation5 + $0x8] sm:$0xff]   ;;  %v227_v2 = vld [vmem:[#allocation5] sm:$0xff]  }
  0x1f   :  { %206 = vmatprep.subr.bf16.mxu0 %v342_v0  ;;  %210 = vmatprep.mubr.msk.bf16.mxu0 %vm343_vm0, %v342_v0  ;;  %v48_v3 = vld [vmem:[#allocation2] sm:$0xff]  ;;  %v49_v4 = vld [vmem:[#allocation2 + $0x8] sm:$0xff]  ;;  %vm74_vm1 = vcmask 261120   ;;  %vm127_vm2 = vcmask 257024   ;;  %s344_s7 = smov [#allocation7]   ;;  %s345_s9 = smov 96  }
  0x20   :  { %207 = vmatpush3.bf16.msra.mxu0 %v226_v1  ;;  %v50_v5 = vpack.c.bf16 %v49_v4, %v48_v3  ;;  %v195_v6 = vld [vmem:[%s418_s2] ss:$0 sm:$0xff]  ;;  %s151_s8 = sshll.u32 %s344_s7, 4  ;;  %s152_s8 = int_to_ptr.vmem [resolvable:$true] %s151_s8 }
  0x21   :  { %208 = vmatprep.subr.bf16.mxu0 %v342_v0  ;;  %s268_s2 = scalar_lea.vmem %s152_s8, 128  ;;  %p273_p11 = scmp.lt.s32.totalorder %s152_s8, %s152_s8 }
  0x22   :  { %p269_p10 = scmp.ne.s32.totalorder %s152_s8, %s268_s2  ;;  %p274_p12 = scmp.lt.s32.totalorder %s268_s2, %s268_s2 }
  0x24   :  { %209 = vmatpush3.bf16.msra.mxu0 %v227_v2  ;;  %p275_p13 = por %p274_p12, %p273_p11 }
  0x26   :  { %p276_p0 = pnand %p275_p13, %p269_p10 }
  0x27   :  { %211 = vmatmul.mubr.msk.bf16.vlgmr.msra.gmra.mxu0 %vm74_vm1, %v50_v5 }
  0xe7   :  { %v112_v7 = vpop.f32.mrf.mxu0 }
  0xe8   :  { %v113_v8 = vadd.f32 %v195_v6, %v112_v7 }
  0xe9   :  { %v212_v9 = vpop.f32.mrf.mxu0 }
  0xea   :  { %v201_v10 = vpack.c.bf16 %v113_v8, %v113_v8 }
  0xeb   :  { %v115_v11 = vpop.f32.mrf.mxu0 }
  0xec   :  { %v116_v12 = vadd.f32 %v195_v6, %v115_v11  ;;  %138 = vrot.lane.b32.xlu1 %v201_v10, %s340_s28  ;;  %130 = vrot.lane.b32.xlu0 %v201_v10, %s345_s9  ;;  %128 = vst.msk [vmem:[#allocation7] sm:$0xf] %vm127_vm2, %v201_v10 }
  0xed   :  { %v213_v13 = vpop.f32.mrf.mxu0 }
  0xee   :  { %v202_v14 = vpack.c.bf16 %v116_v12, %v116_v12 }
  0xf0   :  { %140 = vrot.lane.b32.xlu1 %v202_v14, %s340_s28  ;;  %132 = vrot.lane.b32.xlu0 %v202_v14, %s345_s9  ;;  %129 = vst.msk [vmem:[#allocation7 + $0x4] sm:$0xf] %vm127_vm2, %v202_v14 }
  0xf1   :  { %279 = shalt.err (!%p276_p0)
}
  0xf2   :  { %157 = dma.vmem_to_hbm [thread:$0]  %s152_s8, 128, %s419_s3, [#allocation4], %s340_s28, %s340_s28, %s341_s29  }
  0xf3   :  { %s346_s12 = smov [#allocation8]   ;;  %s347_s14 = smov [#allocation10]  }
  0xf4   :  { %s163_s13 = sshll.u32 %s346_s12, 4  ;;  %s175_s15 = sshll.u32 %s347_s14, 4  ;;  %s164_s13 = int_to_ptr.vmem [resolvable:$true] %s163_s13  ;;  %s176_s15 = int_to_ptr.vmem [resolvable:$true] %s175_s15 }
  0xf5   :  { %s288_s16 = scalar_lea.vmem %s164_s13, 128  ;;  %p293_p2 = scmp.lt.s32.totalorder %s164_s13, %s164_s13 }
  0xf6   :  { %p289_p1 = scmp.ne.s32.totalorder %s164_s13, %s288_s16  ;;  %p294_p3 = scmp.lt.s32.totalorder %s288_s16, %s288_s16 }
  0xf8   :  { %p295_p4 = por %p294_p3, %p293_p2 }
  0xfa   :  { %p296_p5 = pnand %p295_p4, %p289_p1 }
 0x15e   :  { %v139_v15 = vpop.permute.xlu1 %138  ;;  %v131_v16 = vpop.permute.xlu0 %130 }
 0x15f   :  { %144 = vst.msk [vmem:[#allocation10] sm:$0xf] %vm127_vm2, %v139_v15  ;;  %136 = vst.msk [vmem:[#allocation8] sm:$0xf] %vm127_vm2, %v131_v16 }
 0x162   :  { %v141_v17 = vpop.permute.xlu1 %140  ;;  %v133_v18 = vpop.permute.xlu0 %132 }
 0x163   :  { %145 = vst.msk [vmem:[#allocation10 + $0x4] sm:$0xf] %vm127_vm2, %v141_v17  ;;  %137 = vst.msk [vmem:[#allocation8 + $0x4] sm:$0xf] %vm127_vm2, %v133_v18 }
 0x164   :  { %299 = shalt.err (!%p296_p5)
}
 0x165   :  { %169 = dma.vmem_to_hbm [thread:$0]  %s164_s13, 128, %s420_s4, [#allocation9], %s340_s28, %s340_s28, %s341_s29  }
 0x166   :  { %s308_s18 = scalar_lea.vmem %s176_s15, 128  ;;  %p313_p7 = scmp.lt.s32.totalorder %s176_s15, %s176_s15 }
 0x167   :  { %p309_p6 = scmp.ne.s32.totalorder %s176_s15, %s308_s18  ;;  %p314_p8 = scmp.lt.s32.totalorder %s308_s18, %s308_s18 }
 0x169   :  { %p315_p9 = por %p314_p8, %p313_p7 }
 0x16b   :  { %p316_p10 = pnand %p315_p9, %p309_p6 }
 0x16d   :  { %319 = shalt.err (!%p316_p10)
}
 0x16e   :  { %181 = dma.vmem_to_hbm [thread:$0]  %s176_s15, 128, %s421_s5, [#allocation9], %s340_s28, %s340_s28, %s341_s29  }
 0x16f   :  { %332 = dma.done.wait [#allocation4], 128  }
 0x170   :  { %333 = vsyncadd [#allocation4], 4294967168 }
 0x171   :  { %334 = dma.done.wait [#allocation9], 256  }
 0x172   :  { %335 = vsyncadd [#allocation9], 4294967040 }
 0x173   :  { %191 = vsyncpa [#allocation3], 1 }
 0x174   :  { %192 = vsyncpa [#allocation6], 1 }
 0x175   :  { %193 = vsyncpa [#allocation4], 1 }
 0x176   :  { %194 = vsyncpa [#allocation9], 1 }

</bundles_post_ra>
